<compile_context>
chip_gen: v7x
topology: tpu7x:2x2x1
jax: 0.10.0
libtpu: 0.0.40
codegen_flags: <defaults>
</compile_context>

<pallas_src>
import jax
import jax.numpy as jnp
from jax.experimental import pallas as pl
from jax.experimental.pallas import tpu as pltpu


def _round_up(x, m):
    return ((x + m - 1) // m) * m


def decoder_kernel(x_ref, w1_ref, b1_ref, w2_ref, b2_ref, w3_ref, b3_ref, o_ref):
    # x_ref: (tile_m, latent) bf16 tile of the batch.
    # wN_ref: bf16 weights, VMEM-resident across the whole grid.
    # bN_ref: f32 biases. All matmuls accumulate in f32 on the MXU.
    x = x_ref[...]

    # Linear(latent -> l0)  (no activation, matching the PyTorch Sequential)
    h1 = jnp.dot(x, w1_ref[...], preferred_element_type=jnp.float32) + b1_ref[...]

    # Linear(l0 -> l1) + Tanh  (tanh -> EUP slot)
    h2 = jnp.dot(h1.astype(w2_ref.dtype), w2_ref[...],
                 preferred_element_type=jnp.float32) + b2_ref[...]
    h2 = jnp.tanh(h2)

    # Linear(l1 -> out) + Sigmoid  (exp -> EUP, approx reciprocal -> EUP)
    logits = jnp.dot(h2.astype(w3_ref.dtype), w3_ref[...],
                     preferred_element_type=jnp.float32) + b3_ref[...]
    o_ref[...] = pl.reciprocal(1.0 + jnp.exp(-logits), approx=True).astype(o_ref.dtype)


def decoder_forward(x, params, *, tile_m=256):
    w1, b1, w2, b2, w3, b3 = params
    batch, latent = x.shape
    l0 = w1.shape[1]
    l1 = w2.shape[1]
    out_dim = w3.shape[1]

    # Lane-dense output: pad the final layer's columns to a multiple of 128 so
    # output stores are unmasked full-lane writes.
    out_pad = _round_up(out_dim, 128)
    if out_pad != out_dim:
        w3 = jnp.pad(w3, ((0, 0), (0, out_pad - out_dim)))
        b3 = jnp.pad(b3, ((0, 0), (0, out_pad - out_dim)))

    # Batch tile: multiple of 8 sublanes, no larger than the padded batch.
    # Larger tiles amortize the ~0.35 us per-grid-step overhead.
    tile_m = max(8, min(_round_up(tile_m, 8), _round_up(batch, 8)))
    m_pad = _round_up(batch, tile_m)
    if m_pad != batch:
        x = jnp.pad(x, ((0, m_pad - batch), (0, 0)))

    # bf16 streams for x and weights (halves HBM->VMEM bytes, full MXU rate);
    # biases, accumulation and elementwise epilogues stay f32.
    xb = x.astype(jnp.bfloat16)
    w1b, w2b, w3b = (w.astype(jnp.bfloat16) for w in (w1, w2, w3))
    b1f, b2f, b3f = (b.astype(jnp.float32) for b in (b1, b2, b3))

    grid = (m_pad // tile_m,)
    resident = lambda a: pl.BlockSpec(a.shape, lambda i: (0, 0))

    # VMEM footprint estimate (bytes): double-buffered bf16 weights + f32
    # biases + double-buffered bf16 x tile + f32 intermediates/output tiles.
    vmem_est = (
        2 * 2 * (latent * l0 + l0 * l1 + l1 * out_pad)     # bf16 weights x2 buf
        + 2 * 4 * (l0 + l1 + out_pad)                      # f32 biases x2 buf
        + 2 * 2 * tile_m * latent                          # bf16 x tile x2 buf
        + 4 * tile_m * (l0 + l1 + out_pad)                 # f32 intermediates
        + 2 * 4 * tile_m * out_pad                         # f32 output x2 buf
    )
    vmem_limit = int(min(max(2 * vmem_est, 16 << 20), 48 << 20))

    out = pl.pallas_call(
        decoder_kernel,
        out_shape=jax.ShapeDtypeStruct((m_pad, out_pad), jnp.float32),
        grid=grid,
        in_specs=[
            pl.BlockSpec((tile_m, latent), lambda i: (i, 0)),   # x: per-tile
            resident(w1b), resident(b1f),                       # weights/biases:
            resident(w2b), resident(b2f),                       #   constant index
            resident(w3b), resident(b3f),                       #   (VMEM resident)
        ],
        out_specs=pl.BlockSpec((tile_m, out_pad), lambda i: (i, 0)),
        compiler_params=pltpu.CompilerParams(
            dimension_semantics=("parallel",),   # v7x dual-TC sharding; no-op v5e/v6e
            vmem_limit_bytes=vmem_limit,
        ),
    )(xb, w1b, b1f, w2b, b2f, w3b, b3f)

    return out[:batch, :out_dim]


def xavier_uniform(key, fan_in, fan_out, dtype=jnp.float32):
    # Matches torch.nn.init.xavier_uniform_ on a (fan_out, fan_in) weight;
    # directly produces the (fan_in, fan_out) layout used by the kernel.
    bound = (6.0 / (fan_in + fan_out)) ** 0.5
    return jax.random.uniform(key, (fan_in, fan_out), dtype, minval=-bound, maxval=bound)


def init_decoder_params(key, latent_dim, layers, output_dim):
    k1, k2, k3 = jax.random.split(key, 3)
    w1 = xavier_uniform(k1, latent_dim, layers[0])
    b1 = jnp.zeros((1, layers[0]), jnp.float32)
    w2 = xavier_uniform(k2, layers[0], layers[1])
    b2 = jnp.zeros((1, layers[1]), jnp.float32)
    w3 = xavier_uniform(k3, layers[1], output_dim)
    b3 = jnp.zeros((1, output_dim), jnp.float32)
    return (w1, b1, w2, b2, w3, b3)


def decoder_reference(x, params):
    w1, b1, w2, b2, w3, b3 = params
    h1 = x @ w1 + b1
    h2 = jnp.tanh(h1 @ w2 + b2)
    return jax.nn.sigmoid(h2 @ w3 + b3)


if __name__ == "__main__":
    # Small shapes consistent with the module (production: output_dim=2000,
    # latent=50, layers=[256, 512]); output_dim=500 exercises the lane-dense
    # padding path (500 -> 512); batch=64 with tile_m=32 exercises the grid
    # and the batch-padding-free path.
    batch, latent_dim, layers, output_dim = 64, 32, [128, 256], 500

    key = jax.random.PRNGKey(0)
    kx, kp = jax.random.split(key)
    x = jax.random.normal(kx, (batch, latent_dim), jnp.float32)
    params = init_decoder_params(kp, latent_dim, layers, output_dim)

    y = decoder_forward(x, params, tile_m=32)
    y = jax.block_until_ready(y)

    y_ref = decoder_reference(x, params)
    assert y.shape == (batch, output_dim)
    # bf16 weight/activation streams (f32 accumulation): loosened tolerance.
    assert jnp.max(jnp.abs(y - y_ref)) < 2e-2, "mismatch vs reference"

    print("KERNEL_OK")
</pallas_src>

<mosaic_0001>
module attributes {stable_mosaic.version = 11 : i64} {
  func.func @decoder_kernel(%arg0: i32, %arg1: memref<32x32xbf16, #tpu.memory_space<vmem>>, %arg2: memref<32x128xbf16, #tpu.memory_space<vmem>>, %arg3: memref<1x128xf32, #tpu.memory_space<vmem>>, %arg4: memref<128x256xbf16, #tpu.memory_space<vmem>>, %arg5: memref<1x256xf32, #tpu.memory_space<vmem>>, %arg6: memref<256x512xbf16, #tpu.memory_space<vmem>>, %arg7: memref<1x512xf32, #tpu.memory_space<vmem>>, %arg8: memref<32x512xf32, #tpu.memory_space<vmem>>) attributes {dimension_semantics = [#tpu.dimension_semantics<parallel>], iteration_bounds = array<i64: 2>, scalar_prefetch = 0 : i64, scratch_operands = 0 : i64, tpu.core_type = #tpu.core_type<tc>, window_params = [{transform_indices = @transform_0, window_bounds = array<i64: 32, 32>}, {pipeline_mode = #tpu.pipeline_mode<synchronous>, transform_indices = @transform_1, window_bounds = array<i64: 32, 128>}, {pipeline_mode = #tpu.pipeline_mode<synchronous>, transform_indices = @transform_2, window_bounds = array<i64: 1, 128>}, {pipeline_mode = #tpu.pipeline_mode<synchronous>, transform_indices = @transform_3, window_bounds = array<i64: 128, 256>}, {pipeline_mode = #tpu.pipeline_mode<synchronous>, transform_indices = @transform_4, window_bounds = array<i64: 1, 256>}, {pipeline_mode = #tpu.pipeline_mode<synchronous>, transform_indices = @transform_5, window_bounds = array<i64: 256, 512>}, {pipeline_mode = #tpu.pipeline_mode<synchronous>, transform_indices = @transform_6, window_bounds = array<i64: 1, 512>}, {transform_indices = @transform_7, window_bounds = array<i64: 32, 512>}]} {
    %c0 = arith.constant 0 : index
    %c0_0 = arith.constant 0 : index
    %0 = vector.load %arg1[%c0, %c0_0] : memref<32x32xbf16, #tpu.memory_space<vmem>>, vector<32x32xbf16>
    %c0_1 = arith.constant 0 : index
    %c0_2 = arith.constant 0 : index
    %1 = vector.load %arg2[%c0_1, %c0_2] : memref<32x128xbf16, #tpu.memory_space<vmem>>, vector<32x128xbf16>
    %cst = arith.constant dense<0.000000e+00> : vector<32x128xf32>
    %2 = tpu.matmul %0, %1, %cst {dimension_numbers = #tpu.dot_dimension_numbers<[1], [0], [0], [1], [0, 0, 1, 1], [], []>} : vector<32x32xbf16>, vector<32x128xbf16>, vector<32x128xf32> -> vector<32x128xf32>
    %c0_3 = arith.constant 0 : index
    %c0_4 = arith.constant 0 : index
    %3 = vector.load %arg3[%c0_3, %c0_4] : memref<1x128xf32, #tpu.memory_space<vmem>>, vector<1x128xf32>
    %4 = vector.broadcast %3 : vector<1x128xf32> to vector<32x128xf32>
    %5 = arith.addf %2, %4 : vector<32x128xf32>
    %6 = arith.truncf %5 : vector<32x128xf32> to vector<32x128xbf16>
    %c0_5 = arith.constant 0 : index
    %c0_6 = arith.constant 0 : index
    %7 = vector.load %arg4[%c0_5, %c0_6] : memref<128x256xbf16, #tpu.memory_space<vmem>>, vector<128x256xbf16>
    %cst_7 = arith.constant dense<0.000000e+00> : vector<32x256xf32>
    %8 = tpu.matmul %6, %7, %cst_7 {dimension_numbers = #tpu.dot_dimension_numbers<[1], [0], [0], [1], [0, 0, 1, 1], [], []>} : vector<32x128xbf16>, vector<128x256xbf16>, vector<32x256xf32> -> vector<32x256xf32>
    %c0_8 = arith.constant 0 : index
    %c0_9 = arith.constant 0 : index
    %9 = vector.load %arg5[%c0_8, %c0_9] : memref<1x256xf32, #tpu.memory_space<vmem>>, vector<1x256xf32>
    %10 = vector.broadcast %9 : vector<1x256xf32> to vector<32x256xf32>
    %11 = arith.addf %8, %10 : vector<32x256xf32>
    %12 = math.tanh %11 : vector<32x256xf32>
    %13 = arith.truncf %12 : vector<32x256xf32> to vector<32x256xbf16>
    %c0_10 = arith.constant 0 : index
    %c0_11 = arith.constant 0 : index
    %14 = vector.load %arg6[%c0_10, %c0_11] : memref<256x512xbf16, #tpu.memory_space<vmem>>, vector<256x512xbf16>
    %cst_12 = arith.constant dense<0.000000e+00> : vector<32x512xf32>
    %15 = tpu.matmul %13, %14, %cst_12 {dimension_numbers = #tpu.dot_dimension_numbers<[1], [0], [0], [1], [0, 0, 1, 1], [], []>} : vector<32x256xbf16>, vector<256x512xbf16>, vector<32x512xf32> -> vector<32x512xf32>
    %c0_13 = arith.constant 0 : index
    %c0_14 = arith.constant 0 : index
    %16 = vector.load %arg7[%c0_13, %c0_14] : memref<1x512xf32, #tpu.memory_space<vmem>>, vector<1x512xf32>
    %17 = vector.broadcast %16 : vector<1x512xf32> to vector<32x512xf32>
    %18 = arith.addf %15, %17 : vector<32x512xf32>
    %cst_15 = arith.constant 0.000000e+00 : f32
    %19 = vector.broadcast %cst_15 : f32 to vector<32x512xf32>
    %20 = arith.subf %19, %18 : vector<32x512xf32>
    %21 = math.exp %20 : vector<32x512xf32>
    %cst_16 = arith.constant 1.000000e+00 : f32
    %22 = vector.broadcast %cst_16 : f32 to vector<32x512xf32>
    %23 = arith.addf %22, %21 : vector<32x512xf32>
    %24 = tpu.reciprocal %23 {approx = true} : vector<32x512xf32> -> vector<32x512xf32>
    %c0_17 = arith.constant 0 : index
    %c0_18 = arith.constant 0 : index
    %25 = vector.load %arg8[%c0_17, %c0_18] : memref<32x512xf32, #tpu.memory_space<vmem>>, vector<32x512xf32>
    tpu.vector_store %arg8[%c0_17, %c0_18], %24 {strides = array<i32>} : memref<32x512xf32, #tpu.memory_space<vmem>>, vector<32x512xf32>,
    return
  }
  func.func @transform_0(%arg0: i32) -> (i32, i32) {
    %c0_i32 = arith.constant 0 : i32
    %c0_i32_0 = arith.constant 0 : i32
    return %arg0, %c0_i32 : i32, i32
  }
  func.func @transform_1(%arg0: i32) -> (i32, i32) {
    %c0_i32 = arith.constant 0 : i32
    %c0_i32_0 = arith.constant 0 : i32
    %c0_i32_1 = arith.constant 0 : i32
    return %c0_i32, %c0_i32_0 : i32, i32
  }
  func.func @transform_2(%arg0: i32) -> (i32, i32) {
    %c0_i32 = arith.constant 0 : i32
    %c0_i32_0 = arith.constant 0 : i32
    %c0_i32_1 = arith.constant 0 : i32
    return %c0_i32, %c0_i32_0 : i32, i32
  }
  func.func @transform_3(%arg0: i32) -> (i32, i32) {
    %c0_i32 = arith.constant 0 : i32
    %c0_i32_0 = arith.constant 0 : i32
    %c0_i32_1 = arith.constant 0 : i32
    return %c0_i32, %c0_i32_0 : i32, i32
  }
  func.func @transform_4(%arg0: i32) -> (i32, i32) {
    %c0_i32 = arith.constant 0 : i32
    %c0_i32_0 = arith.constant 0 : i32
    %c0_i32_1 = arith.constant 0 : i32
    return %c0_i32, %c0_i32_0 : i32, i32
  }
  func.func @transform_5(%arg0: i32) -> (i32, i32) {
    %c0_i32 = arith.constant 0 : i32
    %c0_i32_0 = arith.constant 0 : i32
    %c0_i32_1 = arith.constant 0 : i32
    return %c0_i32, %c0_i32_0 : i32, i32
  }
  func.func @transform_6(%arg0: i32) -> (i32, i32) {
    %c0_i32 = arith.constant 0 : i32
    %c0_i32_0 = arith.constant 0 : i32
    %c0_i32_1 = arith.constant 0 : i32
    return %c0_i32, %c0_i32_0 : i32, i32
  }
  func.func @transform_7(%arg0: i32) -> (i32, i32) {
    %c0_i32 = arith.constant 0 : i32
    %c0_i32_0 = arith.constant 0 : i32
    return %arg0, %c0_i32 : i32, i32
  }
}

</mosaic_0001>

<bundles_post_ra>
// kernel: tpu_custom_call.1
= control target key start
LH: loop header
LB: loop body
LE: loop exit
PB: predicated region body
PF: predicated region fallthrough
CT: control target
= control target key end

     0   :  { %12 = vsyncpa [#allocation3], 0  ;;  %s2085_s0 = inlined_call_operand.vmem [shape: bf16[64,32], index: 0, kind: input, shape index: {}]   ;;  %s2086_s1 = inlined_call_operand.vmem [shape: bf16[32,128], index: 1, kind: input, shape index: {}]   ;;  %s2087_s2 = inlined_call_operand.vmem [shape: f32[1,128], index: 2, kind: input, shape index: {}]   ;;  %s2088_s3 = inlined_call_operand.hbm [shape: bf16[128,256], index: 3, kind: input, shape index: {}]   ;;  %s2089_s4 = inlined_call_operand.vmem [shape: f32[1,256], index: 4, kind: input, shape index: {}]   ;;  %s2090_s5 = inlined_call_operand.hbm [shape: bf16[256,512], index: 5, kind: input, shape index: {}]   ;;  %s2091_s6 = inlined_call_operand.vmem [shape: f32[1,512], index: 6, kind: input, shape index: {}]   ;;  %s2092_s7 = inlined_call_operand.hbm [shape: f32[64,512], index: 7, kind: output, shape index: {}]  }
   0x1   :  { %13 = vsyncpa [#allocation6], 0 }
   0x2   :  { %14 = vsyncpa [#allocation4], 0 }
   0x3   :  { %16 = vsyncpa [#allocation4 + $0x1], 0  ;;  %s1853_s24 = smov 0   ;;  %s1855_s25 = smov 0  }
   0x4   :  { %s1857_s26 = smov 0   ;;  %s1859_s27 = smov 0  }
   0x5 LB: > { %s1874_s28 = sadd.s32 4294967295, %s1801_s27   ;;  %s1286_s29 = sadd.s32 4294967294, %s1801_s27   ;;  %s1801_s27 = sphi %s1859_s27, %s2112_s27   ;;  %s1797_s26 = sphi %s1857_s26, %s2111_s26   ;;  %s1793_s25 = sphi %s1855_s25, %s2110_s25   ;;  %s1789_s24 = sphi %s1853_s24, %s2109_s24  }
   0x6   : > { %s1878_s30 = sadd.s32 1, %s1801_s27   ;;  %s181_s8 = sadd.s32 1, %s1797_s26 }
   0x7   : > { %s178_s9 = ssub.s32 %s1801_s27, %s1878_s30  ;;  %p191_p0 = scmp.ne.s32.totalorder %s1797_s26, %s1793_s25 }
   0x8   : > { %p179_p1 = scmp.eq.s32.totalorder %s178_s9, 0  ;;  %p192_p2 = scmp.eq.s32.totalorder %s1874_s28, 1 }
   0x9   : > { %p197_p3 = scmp.ne.s32.totalorder %s1793_s25, %s1789_s24  ;;  %p198_p4 = scmp.eq.s32.totalorder %s1286_s29, 1 }
   0xa   : > { %s1889_s10 = scalar_select %p179_p1, %s1797_s26, %s181_s8  }
   0xb   : > { %p1891_p5 = por %p192_p2, %p191_p0  ;;  %p1895_p6 = por %p198_p4, %p197_p3 }
   0xc   : > { %2096 = sst [smem:[#allocation11_spill]] %s1889_s10  ;;  %p1287_p7 = scmp.ge.s32.totalorder %s1801_s27, 1 }
   0xd   : > { %s2097_s11 = scalar_select %p1891_p5, 1, 0 }
   0xe   : > { %s2098_s12 = scalar_select %p1895_p6, 1, 0 }
   0xf   : > { %p205_p8 = scmp.lt.s32.totalorder %s1801_s27, 3  ;;  %p2093_p9 = scmp.eq.s32.totalorder %s1874_s28, 0 }
  0x10   : > { %s1803_s14 = smov [#allocation2]   ;;  %s1804_s17 = smov [#allocation5]  }
  0x11   : > { %p1902_p10 = pnand %p1287_p7, %p205_p8  ;;  %s223_s15 = sshll.u32 %s1803_s14, 4  ;;  %s224_s15 = int_to_ptr.vmem [resolvable:$true] %s223_s15 }
  0x12   : > { %s239_s18 = sshll.u32 %s1804_s17, 4  ;;  %s1675_s21 = scalar_lea.hbm %s2088_s3, 2048  ;;  %s1914_s18 = int_to_ptr.vmem [resolvable:$true] %s239_s18 }
  0x13   : > { %s2099_s13 = scalar_select %p1902_p10, 1, 0 }
  0x14   : > { %p1414_p11 = pneg %p1902_p10  ;;  %p1676_p13 = scmp.ne.s32.totalorder %s2088_s3, %s1675_s21 }
  0x15   : > { %p1682_p3 = scmp.lt.u32.totalorder %s1675_s21, %s2088_s3 }
  0x16   : > { %p1910_p12 = pnand %p2093_p9, %p1414_p11 }
  0x18   : > { %p1677_p0 = pneg %p1910_p12 }
  0x1a   : > { %p1678_p1 = pnand %p1677_p0, %p1676_p13 }
  0x1c   : > { %p1679_p2 = pneg %p1678_p1 }
  0x1e   : > { %p1684_p4 = pnand %p1682_p3, %p1679_p2 }
  0x20   : > { %1687 = shalt.err (!%p1684_p4)
}
  0x21   : > { %s1688_s9 = scalar_lea.vmem %s224_s15, 2048  ;;  %p1696_p9 = scmp.lt.s32.totalorder %s224_s15, %s224_s15 }
  0x22   : > { %p1689_p7 = scmp.ne.s32.totalorder %s224_s15, %s1688_s9  ;;  %p1697_p6 = scmp.lt.s32.totalorder %s1688_s9, %s1688_s9 }
  0x24   : > { %p1691_p8 = pnand %p1689_p7, %p1677_p0  ;;  %p1698_p5 = por %p1697_p6, %p1696_p9 }
  0x26   : > { %p1692_p11 = pneg %p1691_p8 }
  0x28   : > { %p1699_p10 = pnand %p1698_p5, %p1692_p11 }
  0x2a   : > { %1702 = shalt.err (!%p1699_p10)
}
  0x2b   : > { %s1805_s14 = smov 128   ;;  %s1806_s17 = smov 8  }
  0x2c   : > { %1417 = dma.hbm_to_vmem [thread:$0]  (!%p1910_p12), %s2088_s3, 2048, %s224_s15, [#allocation3], %s1805_s14, %s1805_s14, %s1806_s17  }
  0x2d   : > { %s1703_s23 = scalar_lea.hbm %s2090_s5, 8192 }
  0x2e   : > { %p1704_p13 = scmp.ne.s32.totalorder %s2090_s5, %s1703_s23  ;;  %p1710_p9 = scmp.lt.u32.totalorder %s1703_s23, %s2090_s5 }
  0x30   : > { %p1706_p5 = pnand %p1704_p13, %p1677_p0 }
  0x32   : > { %p1707_p6 = pneg %p1706_p5 }
  0x34   : > { %p1712_p10 = pnand %p1710_p9, %p1707_p6 }
  0x36   : > { %1715 = shalt.err (!%p1712_p10)
}
  0x37   : > { %s1716_s15 = scalar_lea.vmem %s1914_s18, 8192  ;;  %p1724_p4 = scmp.lt.s32.totalorder %s1914_s18, %s1914_s18 }
  0x38   : > { %p1717_p1 = scmp.ne.s32.totalorder %s1914_s18, %s1716_s15  ;;  %p1725_p7 = scmp.lt.s32.totalorder %s1716_s15, %s1716_s15 }
  0x3a   : > { %p1719_p2 = pnand %p1717_p1, %p1677_p0  ;;  %p1726_p8 = por %p1725_p7, %p1724_p4 }
  0x3c   : > { %p1720_p3 = pneg %p1719_p2 }
  0x3e   : > { %p1727_p11 = pnand %p1726_p8, %p1720_p3 }
  0x40   : > { %1730 = shalt.err (!%p1727_p11)
}
  0x41   : > { %s1807_s10 = smov 256   ;;  %s1808_s14 = smov 16  }
  0x42   : > { %1420 = dma.hbm_to_vmem [thread:$0]  (!%p1910_p12), %s2090_s5, 8192, %s1914_s18, [#allocation6], %s1807_s10, %s1807_s10, %s1808_s14  }
  0x43   : > { %p2101_p13 = scmp.ne.s32.totalorder %s2099_s13, 0 }
  0x44   : > { %p2102_p0 = scmp.eq.s32.totalorder (!%p2101_p13), %s1874_s28, 0 }
  0x45   : > { %267 = sbr.rel (%p2101_p13) target bundleno = 824 (0x338), region = 48 }
  0x4c   : > { %1776 = dma.done.wait (%p2102_p0), [#allocation3], 2048   ;;  %p2103_p5 = pmov %p2102_p0 }
  0x4d   : > { %p2104_p6 = pmov %p2102_p0 }
  0x4e   : > { %1778 = vsyncadd (%p2103_p5), [#allocation3], 4294965248 }
  0x4f   : > { %1780 = dma.done.wait (%p2104_p6), [#allocation6], 8192   ;;  %p2105_p9 = pmov %p2102_p0 }
  0x50   : > { %s1295_s16 = sshll.u32 %s1874_s28, 2  ;;  %v1471_v0 = vld [vmem:[%s2086_s1] sm:$0xff]   ;;  %v1472_v1 = vld [vmem:[%s2086_s1 + $0x8] sm:$0xff]   ;;  %vm348_vm0 = vcmask 261120   ;;  %v1478_v6 = vld [vmem:[#allocation2 + $0x14] ss:$8 sps:$4 sm:$0xff]  }
  0x51   : > { %1782 = vsyncadd (%p2105_p9), [#allocation6], 4294959104  ;;  %p304_p10 = scmp.lt.s32.totalorder %s1295_s16, 7  ;;  %1396 = vmatprep.subr.bf16.mxu0 %v1471_v0  ;;  %v1475_v3 = vld [vmem:[#allocation2 + $0x4] ss:$8 sps:$4 sm:$0xff]   ;;  %v1809_v20 = vmov 0  }
  0x52   : > { %1397 = vmatpush3.bf16.msra.mxu0 %v1471_v0  ;;  %v1477_v4 = vld [vmem:[#allocation2] ss:$8 sps:$4 sm:$0xff]   ;;  %514 = vmatprep.subr.bf16.mxu1 %v1475_v3  ;;  %v1480_v7 = vld [vmem:[#allocation2 + $0x10] ss:$8 sps:$4 sm:$0xff]   ;;  %v1481_v8 = vld [vmem:[#allocation2 + $0x24] ss:$8 sps:$4 sm:$0xff]  }
  0x53   : > { %s2114_s16 = smov (!%p304_p10, %s1295_s16), 7  ;;  %1398 = vmatprep.subr.bf16.mxu0 %v1472_v1  ;;  %515 = vmatpush1.bf16.msra.mxu1 %v1477_v4  ;;  %v1483_v9 = vld [vmem:[#allocation2 + $0x20] ss:$8 sps:$4 sm:$0xff]   ;;  %v1484_v10 = vld [vmem:[#allocation2 + $0x34] ss:$8 sps:$4 sm:$0xff]   ;;  %s1391_s13 = sshll.u32 %s1874_s28, 11 }
  0x54   : > { %s1296_s18 = sshll.u32 %s2114_s16, 2  ;;  %516 = vmatprep.subr.bf16.mxu1 %v1478_v6  ;;  %v1486_v11 = vld [vmem:[#allocation2 + $0x30] ss:$8 sps:$4 sm:$0xff]   ;;  %v1487_v12 = vld [vmem:[#allocation2 + $0x44] ss:$8 sps:$4 sm:$0xff]   ;;  %546 = vmatprep.mubr.bf16.mxu1 %v1809_v20  ;;  %s300_s16 = sand.u32 1, %s1793_s25  }
  0x55   : > { %s307_s21 = scalar_lea.vmem %s2085_s0, %s1296_s18  ;;  %v1489_v13 = vld [vmem:[#allocation2 + $0x40] ss:$8 sps:$4 sm:$0xff]   ;;  %v1490_v14 = vld [vmem:[#allocation2 + $0x54] ss:$8 sps:$4 sm:$0xff]   ;;  %v1492_v15 = vld [vmem:[#allocation2 + $0x50] ss:$8 sps:$4 sm:$0xff]   ;;  %s2035_s29 = scalar_lea.hbm %s2092_s7, %s1391_s13 }
  0x56   : > { %v1473_v2 = vld [vmem:[%s307_s21] sm:$0xff]   ;;  %v1474_v5 = vld [vmem:[%s307_s21 + $0x8] sm:$0xff]   ;;  %1399 = vmatpush3.bf16.msra.mxu0 %v1472_v1  ;;  %v1496_v18 = vld [vmem:[#allocation2 + $0x74] ss:$8 sps:$4 sm:$0xff]   ;;  %s1294_s18 = sshll.u32 %s300_s16, 7  ;;  %s2044_s8 = scalar_lea.sflag [#allocation4], %s300_s16 }
  0x57   : > { %1400 = vmatprep.mubr.msk.bf16.mxu0 %vm348_vm0, %v1473_v2  ;;  %517 = vmatpush1.bf16.msra.mxu1 %v1480_v7  ;;  %v1493_v16 = vld [vmem:[#allocation2 + $0x64] ss:$8 sps:$4 sm:$0xff]   ;;  %v1495_v17 = vld [vmem:[#allocation2 + $0x60] ss:$8 sps:$4 sm:$0xff]   ;;  %v1498_v19 = vld [vmem:[#allocation2 + $0x70] ss:$8 sps:$4 sm:$0xff]  }
  0x58   : > { %518 = vmatprep.subr.bf16.mxu1 %v1481_v8  ;;  %v1499_v21 = vld [vmem:[#allocation5] ss:$16 sps:$4 sm:$0xff]   ;;  %v1501_v22 = vld [vmem:[#allocation5 + $0x4] ss:$16 sps:$4 sm:$0xff]   ;;  %v1504_v23 = vld [vmem:[#allocation5 + $0xc] ss:$16 sps:$4 sm:$0xff]  }
  0x59   : > { %1401 = vmatmul.mubr.msk.bf16.vlgmr.msra.gmra.mrb[0].mxu0 %vm348_vm0, %v1474_v5  ;;  %v1507_v24 = vld [vmem:[#allocation5 + $0x24] ss:$16 sps:$4 sm:$0xff]   ;;  %985 = vmatprep.subr.bf16.mxu0 %v1501_v22  ;;  %v1505_v25 = vld [vmem:[#allocation5 + $0x20] ss:$16 sps:$4 sm:$0xff]   ;;  %v1502_v54 = vld [vmem:[#allocation5 + $0x8] ss:$16 sps:$4 sm:$0xff]  }
  0x5a   : > { %986 = vmatpush1.bf16.msra.mxu0 %v1499_v21  ;;  %v1513_v26 = vld [vmem:[#allocation5 + $0x44] ss:$16 sps:$4 sm:$0xff]   ;;  %v1511_v27 = vld [vmem:[#allocation5 + $0x40] ss:$16 sps:$4 sm:$0xff]   ;;  %v1510_v56 = vld [vmem:[#allocation5 + $0x2c] ss:$16 sps:$4 sm:$0xff]  }
  0x5b   : > { %519 = vmatpush1.bf16.msra.mxu1 %v1483_v9  ;;  %987 = vmatprep.subr.bf16.mxu0 %v1507_v24  ;;  %v1519_v28 = vld [vmem:[#allocation5 + $0x64] ss:$16 sps:$4 sm:$0xff]   ;;  %v1517_v29 = vld [vmem:[#allocation5 + $0x60] ss:$16 sps:$4 sm:$0xff]   ;;  %v1508_v57 = vld [vmem:[#allocation5 + $0x28] ss:$16 sps:$4 sm:$0xff]  }
  0x5c   : > { %520 = vmatprep.subr.bf16.mxu1 %v1484_v10  ;;  %v1525_v30 = vld [vmem:[#allocation5 + $0x84] ss:$16 sps:$4 sm:$0xff]   ;;  %v1523_v31 = vld [vmem:[#allocation5 + $0x80] ss:$16 sps:$4 sm:$0xff]   ;;  %v1516_v58 = vld [vmem:[#allocation5 + $0x4c] ss:$16 sps:$4 sm:$0xff]  }
  0x5d   : > { %v1531_v32 = vld [vmem:[#allocation5 + $0xa4] ss:$16 sps:$4 sm:$0xff]   ;;  %v1529_v33 = vld [vmem:[#allocation5 + $0xa0] ss:$16 sps:$4 sm:$0xff]   ;;  %v1514_v59 = vld [vmem:[#allocation5 + $0x48] ss:$16 sps:$4 sm:$0xff]  }
  0x5e   : > { %988 = vmatpush1.bf16.msra.mxu0 %v1505_v25  ;;  %v1537_v34 = vld [vmem:[#allocation5 + $0xc4] ss:$16 sps:$4 sm:$0xff]   ;;  %v1535_v35 = vld [vmem:[#allocation5 + $0xc0] ss:$16 sps:$4 sm:$0xff]   ;;  %v1522_v60 = vld [vmem:[#allocation5 + $0x6c] ss:$16 sps:$4 sm:$0xff]  }
  0x5f   : > { %521 = vmatpush1.bf16.msra.mxu1 %v1486_v11  ;;  %989 = vmatprep.subr.bf16.mxu0 %v1513_v26  ;;  %v1543_v36 = vld [vmem:[#allocation5 + $0xe4] ss:$16 sps:$4 sm:$0xff]   ;;  %v1541_v37 = vld [vmem:[#allocation5 + $0xe0] ss:$16 sps:$4 sm:$0xff]   ;;  %v1520_v61 = vld [vmem:[#allocation5 + $0x68] ss:$16 sps:$4 sm:$0xff]  }
  0x60   : > { %522 = vmatprep.subr.bf16.mxu1 %v1487_v12  ;;  %v1549_v38 = vld [vmem:[#allocation5 + $0x104] ss:$16 sps:$4 sm:$0xff]   ;;  %v1547_v39 = vld [vmem:[#allocation5 + $0x100] ss:$16 sps:$4 sm:$0xff]   ;;  %v1528_v62 = vld [vmem:[#allocation5 + $0x8c] ss:$16 sps:$4 sm:$0xff]  }
  0x61   : > { %v1555_v40 = vld [vmem:[#allocation5 + $0x124] ss:$16 sps:$4 sm:$0xff]   ;;  %v1553_v41 = vld [vmem:[#allocation5 + $0x120] ss:$16 sps:$4 sm:$0xff]   ;;  %v1526_v63 = vld [vmem:[#allocation5 + $0x88] ss:$16 sps:$4 sm:$0xff]  }
  0x62   : > { %990 = vmatpush1.bf16.msra.mxu0 %v1511_v27  ;;  %v1561_v42 = vld [vmem:[#allocation5 + $0x144] ss:$16 sps:$4 sm:$0xff]   ;;  %v1559_v43 = vld [vmem:[#allocation5 + $0x140] ss:$16 sps:$4 sm:$0xff]   ;;  %v1534_v0 = vld [vmem:[#allocation5 + $0xac] ss:$16 sps:$4 sm:$0xff]  }
  0x63   : > { %523 = vmatpush1.bf16.msra.mxu1 %v1489_v13  ;;  %991 = vmatprep.subr.bf16.mxu0 %v1519_v28  ;;  %v1297_v45 = vld [vmem:[%s2087_s2] ss:$0 sm:$0xff]  ;;  %v1532_v1 = vld [vmem:[#allocation5 + $0xa8] ss:$16 sps:$4 sm:$0xff]   ;;  %v1540_v2 = vld [vmem:[#allocation5 + $0xcc] ss:$16 sps:$4 sm:$0xff]  }
  0x64   : > { %524 = vmatprep.subr.bf16.mxu1 %v1490_v14  ;;  %v1538_v3 = vld [vmem:[#allocation5 + $0xc8] ss:$16 sps:$4 sm:$0xff]   ;;  %v1546_v4 = vld [vmem:[#allocation5 + $0xec] ss:$16 sps:$4 sm:$0xff]   ;;  %v1567_v12 = vld [vmem:[#allocation5 + $0x164] ss:$16 sps:$4 sm:$0xff]  }
  0x65   : > { %v1544_v5 = vld [vmem:[#allocation5 + $0xe8] ss:$16 sps:$4 sm:$0xff]   ;;  %v1552_v6 = vld [vmem:[#allocation5 + $0x10c] ss:$16 sps:$4 sm:$0xff]   ;;  %v1565_v14 = vld [vmem:[#allocation5 + $0x160] ss:$16 sps:$4 sm:$0xff]  }
  0x66   : > { %992 = vmatpush1.bf16.msra.mxu0 %v1517_v29  ;;  %v1550_v7 = vld [vmem:[#allocation5 + $0x108] ss:$16 sps:$4 sm:$0xff]   ;;  %v1558_v8 = vld [vmem:[#allocation5 + $0x12c] ss:$16 sps:$4 sm:$0xff]   ;;  %v1577_v22 = vld [vmem:[#allocation5 + $0x1a0] ss:$16 sps:$4 sm:$0xff]  }
  0x67   : > { %525 = vmatpush1.bf16.msra.mxu1 %v1492_v15  ;;  %993 = vmatprep.subr.bf16.mxu0 %v1525_v30  ;;  %v1556_v9 = vld [vmem:[#allocation5 + $0x128] ss:$16 sps:$4 sm:$0xff]   ;;  %v1564_v10 = vld [vmem:[#allocation5 + $0x14c] ss:$16 sps:$4 sm:$0xff]   ;;  %v1585_v24 = vld [vmem:[#allocation5 + $0x1c4] ss:$16 sps:$4 sm:$0xff]  }
  0x68   : > { %526 = vmatprep.subr.bf16.mxu1 %v1493_v16  ;;  %v1562_v11 = vld [vmem:[#allocation5 + $0x148] ss:$16 sps:$4 sm:$0xff]   ;;  %v1570_v13 = vld [vmem:[#allocation5 + $0x16c] ss:$16 sps:$4 sm:$0xff]   ;;  %v1573_v16 = vld [vmem:[#allocation5 + $0x184] ss:$16 sps:$4 sm:$0xff]  }
  0x69   : > { %v1568_v15 = vld [vmem:[#allocation5 + $0x168] ss:$16 sps:$4 sm:$0xff]   ;;  %v1582_v21 = vld [vmem:[#allocation5 + $0x1ac] ss:$16 sps:$4 sm:$0xff]   ;;  %v1583_v26 = vld [vmem:[#allocation5 + $0x1c0] ss:$16 sps:$4 sm:$0xff]  }
  0x6a   : > { %994 = vmatpush1.bf16.msra.mxu0 %v1523_v31  ;;  %v1588_v25 = vld [vmem:[#allocation5 + $0x1cc] ss:$16 sps:$4 sm:$0xff]   ;;  %v1586_v27 = vld [vmem:[#allocation5 + $0x1c8] ss:$16 sps:$4 sm:$0xff]   ;;  %v1589_v28 = vld [vmem:[#allocation5 + $0x1e0] ss:$16 sps:$4 sm:$0xff]  }
  0x6b   : > { %527 = vmatpush1.bf16.msra.mxu1 %v1495_v17  ;;  %995 = vmatprep.subr.bf16.mxu0 %v1531_v32  ;;  %v1576_v17 = vld [vmem:[#allocation5 + $0x18c] ss:$16 sps:$4 sm:$0xff]   ;;  %v1591_v29 = vld [vmem:[#allocation5 + $0x1e4] ss:$16 sps:$4 sm:$0xff]   ;;  %v1592_v30 = vld [vmem:[#allocation5 + $0x1e8] ss:$16 sps:$4 sm:$0xff]   ;;  %v424_v32 = vlaneseq }
  0x6c   : > { %528 = vmatprep.subr.bf16.mxu1 %v1496_v18  ;;  %v1571_v18 = vld [vmem:[#allocation5 + $0x180] ss:$16 sps:$4 sm:$0xff]   ;;  %v1594_v31 = vld [vmem:[#allocation5 + $0x1ec] ss:$16 sps:$4 sm:$0xff]   ;;  %s2015_s20 = scalar_lea.vmem [#allocation7], %s1294_s18  ;;  %p2106_p1 = scmp.ne.s32.totalorder %s2097_s11, 0 }
  0x6d   : > { %s1202_s21 = sshll.u32 %s2015_s20, 4  ;;  %s1810_s9 = smov [#allocation7]   ;;  %s2037_s21 = int_to_ptr.vmem [resolvable:$true] %s1202_s21 }
  0x6e   : > { %996 = vmatpush1.bf16.msra.mxu0 %v1529_v33  ;;  %v425_v33 = vshrl.u32 %v424_v32, 7  ;;  %s1731_s28 = scalar_lea.vmem %s2037_s21, 2048  ;;  %s1735_s15 = sshll.u32 %s1810_s9, 4  ;;  %s1736_s15 = int_to_ptr.vmem [resolvable:$false] %s1735_s15 }
  0x6f   : > { %529 = vmatpush1.bf16.msra.mxu1 %v1498_v19  ;;  %997 = vmatprep.subr.bf16.mxu0 %v1537_v34  ;;  %v1574_v19 = vld [vmem:[#allocation5 + $0x188] ss:$16 sps:$4 sm:$0xff]   ;;  %p1732_p12 = scmp.ne.s32.totalorder %s2037_s21, %s1731_s28  ;;  %s1737_s10 = scalar_lea.vmem %s1736_s15, 4096 }
  0x70   : > { %1038 = vmatprep.subr.bf16.mxu1 %v1504_v23  ;;  %v1580_v23 = vld [vmem:[#allocation5 + $0x1a8] ss:$16 sps:$4 sm:$0xff]   ;;  %v426_v34 = vsub.s32 0, %v425_v33  ;;  %p1738_p4 = scmp.lt.s32.totalorder %s2037_s21, %s1736_s15  ;;  %p1739_p7 = scmp.lt.s32.totalorder %s1737_s10, %s1731_s28 }
  0x71   : > { %p1733_p2 = pnand %p1732_p12, %p2106_p1 }
  0x72   : > { %998 = vmatpush1.bf16.msra.mxu0 %v1535_v35  ;;  %v422_v35 = vld [vmem:[%s2089_s4] sm:$0x3]  ;;  %p1740_p8 = por %p1739_p7, %p1738_p4 }
  0x73   : > { %999 = vmatprep.subr.bf16.mxu0 %v1543_v36  ;;  %v430_v36 = vsub.s32 1, %v425_v33  ;;  %p1734_p3 = pneg %p1733_p2 }
  0x75   : > { %p1741_p11 = pnand %p1740_p8, %p1734_p3 }
  0x76   : > { %1000 = vmatpush1.bf16.msra.mxu0 %v1541_v37  ;;  %v427_v37 = vrot.slane %v422_v35, %v426_v34 }
  0x77   : > { %1001 = vmatprep.subr.bf16.mxu0 %v1549_v38  ;;  %v431_v38 = vrot.slane %v422_v35, %v430_v36 }
  0x7a   : > { %1002 = vmatpush1.bf16.msra.mxu0 %v1547_v39 }
  0x7b   : > { %1003 = vmatprep.subr.bf16.mxu0 %v1555_v40 }
  0x7e   : > { %1004 = vmatpush1.bf16.msra.mxu0 %v1553_v41 }
  0x7f   : > { %1005 = vmatprep.subr.bf16.mxu0 %v1561_v42 }
  0x82   : > { %1006 = vmatpush1.bf16.msra.mxu0 %v1559_v43 }
  0x83   : > { %1007 = vmatprep.subr.bf16.mxu0 %v1567_v12 }
  0x86   : > { %1008 = vmatpush1.bf16.msra.mxu0 %v1565_v14 }
  0x87   : > { %1009 = vmatprep.subr.bf16.mxu0 %v1573_v16 }
  0x8a   : > { %1010 = vmatpush1.bf16.msra.mxu0 %v1571_v18 }
 0x12c   : > { %v1402_v44 = vpop.f32.mrb[0].mxu0 }
 0x12d   : > { %v389_v46 = vpop.f32.mrb[1].mxu0  ;;  %v398_v48 = vadd.f32 %v1402_v44, %v1297_v45 }
 0x12e   : > { %v1403_v47 = vpop.f32.mrb[2].mxu0  ;;  %v390_v51 = vadd.f32 %v1297_v45, %v389_v46 }
 0x12f   : > { %v401_v49 = vadd.f32 %v1403_v47, %v1297_v45  ;;  %v392_v50 = vpop.f32.mrb[3].mxu0 }
 0x130   : > { %v393_v52 = vadd.f32 %v1297_v45, %v392_v50 }
 0x131   : > { %v405_v53 = vpack.c.bf16 %v401_v49, %v398_v48 }
 0x132   : > { %v404_v55 = vpack.c.bf16 %v393_v52, %v390_v51 }
 0x134   : > { %547 = vmatmul.mubr.bf16.vlgmr.msra.gmra.mrb[0].mxu1 %v404_v55 }
 0x135   : > { %556 = vmatprep.mubr.bf16.mxu1 %v1809_v20  ;;  %1039 = vmatpush1.bf16.msra.mxu1 %v1502_v54  ;;  %v1579_v20 = vld [vmem:[#allocation5 + $0x1a4] ss:$16 sps:$4 sm:$0xff]  }
 0x136   : > { %1040 = vmatprep.subr.bf16.mxu1 %v1510_v56  ;;  %1011 = vmatprep.subr.bf16.mxu0 %v1579_v20 }
 0x137   : > { %1012 = vmatpush1.bf16.msra.mxu0 %v1577_v22 }
 0x138   : > { %1013 = vmatprep.subr.bf16.mxu0 %v1585_v24 }
 0x139   : > { %1041 = vmatpush1.bf16.msra.mxu1 %v1508_v57 }
 0x13a   : > { %1042 = vmatprep.subr.bf16.mxu1 %v1516_v58 }
 0x13b   : > { %1014 = vmatpush1.bf16.msra.mxu0 %v1583_v26 }
 0x13c   : > { %557 = vmatmul.mubr.bf16.gmra.mrb[4].mxu1 %v405_v53  ;;  %1015 = vmatprep.subr.bf16.mxu0 %v1591_v29 }
 0x13d   : > { %1043 = vmatpush1.bf16.msra.mxu1 %v1514_v59 }
 0x13e   : > { %1044 = vmatprep.subr.bf16.mxu1 %v1522_v60 }
 0x13f   : > { %1016 = vmatpush1.bf16.msra.mxu0 %v1589_v28 }
 0x141   : > { %1045 = vmatpush1.bf16.msra.mxu1 %v1520_v61 }
 0x142   : > { %1046 = vmatprep.subr.bf16.mxu1 %v1528_v62 }
 0x145   : > { %1047 = vmatpush1.bf16.msra.mxu1 %v1526_v63 }
 0x146   : > { %1048 = vmatprep.subr.bf16.mxu1 %v1534_v0 }
 0x149   : > { %1049 = vmatpush1.bf16.msra.mxu1 %v1532_v1 }
 0x14a   : > { %1050 = vmatprep.subr.bf16.mxu1 %v1540_v2 }
 0x14d   : > { %1051 = vmatpush1.bf16.msra.mxu1 %v1538_v3  ;;  %v655_v3 = vsub.s32 2, %v425_v33 }
 0x14e   : > { %1052 = vmatprep.subr.bf16.mxu1 %v1546_v4  ;;  %v643_v4 = vld [vmem:[%s2091_s6] sm:$0xf] }
 0x151   : > { %1053 = vmatpush1.bf16.msra.mxu1 %v1544_v5  ;;  %v659_v5 = vsub.s32 3, %v425_v33 }
 0x152   : > { %1054 = vmatprep.subr.bf16.mxu1 %v1552_v6  ;;  %v648_v6 = vrot.slane %v643_v4, %v426_v34 }
 0x155   : > { %1055 = vmatpush1.bf16.msra.mxu1 %v1550_v7  ;;  %v1994_v7 = vrot.slane %v643_v4, %v655_v3 }
 0x156   : > { %1056 = vmatprep.subr.bf16.mxu1 %v1558_v8  ;;  %v1996_v8 = vrot.slane %v643_v4, %v430_v36 }
 0x159   : > { %1057 = vmatpush1.bf16.msra.mxu1 %v1556_v9  ;;  %v1998_v9 = vrot.slane %v643_v4, %v659_v5 }
 0x15a   : > { %1058 = vmatprep.subr.bf16.mxu1 %v1564_v10 }
 0x15d   : > { %1059 = vmatpush1.bf16.msra.mxu1 %v1562_v11 }
 0x15e   : > { %1060 = vmatprep.subr.bf16.mxu1 %v1570_v13 }
 0x161   : > { %1061 = vmatpush1.bf16.msra.mxu1 %v1568_v15 }
 0x162   : > { %1062 = vmatprep.subr.bf16.mxu1 %v1576_v17 }
 0x165   : > { %1063 = vmatpush1.bf16.msra.mxu1 %v1574_v19 }
 0x166   : > { %1064 = vmatprep.subr.bf16.mxu1 %v1582_v21 }
 0x169   : > { %1065 = vmatpush1.bf16.msra.mxu1 %v1580_v23 }
 0x16a   : > { %1066 = vmatprep.subr.bf16.mxu1 %v1588_v25 }
 0x16d   : > { %1067 = vmatpush1.bf16.msra.mxu1 %v1586_v27 }
 0x16e   : > { %1068 = vmatprep.subr.bf16.mxu1 %v1594_v31 }
 0x171   : > { %1069 = vmatpush1.bf16.msra.mxu1 %v1592_v30 }
 0x207   : > { %v548_v39 = vpop.f32.mrb[0].mxu1 }
 0x208   : > { %v549_v40 = vadd.f32 %v548_v39, %v427_v37  ;;  %v550_v41 = vpop.f32.mrb[1].mxu1 }
 0x209   : > { %v551_v42 = vadd.f32 %v550_v41, %v431_v38  ;;  %v552_v43 = vpop.f32.mrb[2].mxu1 }
 0x20a   : > { %1595 = vtanh.f32 %v549_v40  ;;  %v553_v44 = vadd.f32 %v552_v43, %v427_v37  ;;  %v554_v45 = vpop.f32.mrb[3].mxu1 }
 0x20b   : > { %1597 = vtanh.f32 %v551_v42  ;;  %v555_v46 = vadd.f32 %v554_v45, %v431_v38 }
 0x20c   : > { %1599 = vtanh.f32 %v553_v44 }
 0x20d   : > { %1601 = vtanh.f32 %v555_v46 }
 0x20f   : > { %v558_v47 = vpop.f32.mrb[4].mxu1 }
 0x210   : > { %v559_v48 = vadd.f32 %v558_v47, %v427_v37  ;;  %v560_v49 = vpop.f32.mrb[5].mxu1 }
 0x211   : > { %v561_v50 = vadd.f32 %v560_v49, %v431_v38  ;;  %v562_v51 = vpop.f32.mrb[6].mxu1 }
 0x212   : > { %1603 = vtanh.f32 %v559_v48  ;;  %v563_v52 = vadd.f32 %v562_v51, %v427_v37  ;;  %v564_v53 = vpop.f32.mrb[7].mxu1 }
 0x213   : > { %1605 = vtanh.f32 %v561_v50  ;;  %v565_v54 = vadd.f32 %v564_v53, %v431_v38 }
 0x214   : > { %v1596_v55 = vpop.eup %1595  ;;  %1607 = vtanh.f32 %v563_v52 }
 0x215   : > { %v1598_v56 = vpop.eup %1597  ;;  %1609 = vtanh.f32 %v565_v54 }
 0x216   : > { %v1600_v57 = vpop.eup %1599 }
 0x217   : > { %v1602_v58 = vpop.eup %1601  ;;  %v575_v59 = vpack.c.bf16 %v1600_v57, %v1596_v55 }
 0x218   : > { %v576_v60 = vpack.c.bf16 %v1602_v58, %v1598_v56 }
 0x21a   : > { %1017 = vmatprep.mubr.bf16.mxu0 %v576_v60  ;;  %1070 = vmatprep.mubr.bf16.mxu1 %v576_v60 }
 0x21b   : > { %1018 = vmatmul.mubr.bf16.vlgmr.msra.gmra.mrb[4].mxu0 %v575_v59  ;;  %1071 = vmatmul.mubr.bf16.vlgmr.msra.gmra.mrb[8].mxu1 %v575_v59 }
 0x21c   : > { %v1604_v61 = vpop.eup %1603 }
 0x21d   : > { %v1606_v62 = vpop.eup %1605 }
 0x21e   : > { %v1608_v63 = vpop.eup %1607 }
 0x21f   : > { %v1610_v0 = vpop.eup %1609  ;;  %v577_v1 = vpack.c.bf16 %v1608_v63, %v1604_v61 }
 0x220   : > { %v578_v2 = vpack.c.bf16 %v1610_v0, %v1606_v62 }
 0x222   : > { %1027 = vmatprep.mubr.bf16.mxu0 %v578_v2  ;;  %1080 = vmatprep.mubr.bf16.mxu1 %v578_v2 }
 0x223   : > { %1028 = vmatmul.mubr.bf16.gmra.mrb[8].mxu0 %v577_v1  ;;  %1081 = vmatmul.mubr.bf16.gmra.mrb[12].mxu1 %v577_v1 }
 0x2ee   : > { %v1019_v10 = vpop.f32.mrb[4].mxu0  ;;  %v1072_v11 = vpop.f32.mrb[8].mxu1 }
 0x2ef   : > { %v1020_v12 = vadd.f32 %v1019_v10, %v648_v6  ;;  %v1073_v13 = vadd.f32 %v1072_v11, %v1994_v7  ;;  %v1021_v14 = vpop.f32.mrb[5].mxu0  ;;  %v1074_v15 = vpop.f32.mrb[9].mxu1 }
 0x2f0   : > { %v1022_v16 = vadd.f32 %v1021_v14, %v1996_v8  ;;  %v1075_v17 = vadd.f32 %v1074_v15, %v1998_v9  ;;  %v1023_v18 = vpop.f32.mrb[6].mxu0  ;;  %v1076_v19 = vpop.f32.mrb[10].mxu1 }
 0x2f1   : > { %v1091_v20 = vsub.f32 0.0, %v1020_v12  ;;  %v1093_v21 = vsub.f32 0.0, %v1073_v13  ;;  %v1024_v22 = vadd.f32 %v1023_v18, %v648_v6  ;;  %v1077_v23 = vadd.f32 %v1076_v19, %v1994_v7  ;;  %v1025_v24 = vpop.f32.mrb[7].mxu0  ;;  %v1078_v25 = vpop.f32.mrb[11].mxu1 }
 0x2f2   : > { %v1092_v26 = vsub.f32 0.0, %v1022_v16  ;;  %v1094_v27 = vsub.f32 0.0, %v1075_v17  ;;  %v1026_v28 = vadd.f32 %v1025_v24, %v1996_v8  ;;  %v1079_v29 = vadd.f32 %v1078_v25, %v1998_v9 }
 0x2f3   : > { %v1107_v30 = vmul.f32 1.442695, %v1091_v20  ;;  %v1111_v31 = vmul.f32 1.442695, %v1093_v21  ;;  %v1095_v32 = vsub.f32 0.0, %v1024_v22  ;;  %v1097_v33 = vsub.f32 0.0, %v1077_v23 }
 0x2f4   : > { %v1109_v34 = vmul.f32 1.442695, %v1092_v26  ;;  %v1113_v35 = vmul.f32 1.442695, %v1094_v27  ;;  %v1096_v36 = vsub.f32 0.0, %v1026_v28  ;;  %v1098_v37 = vsub.f32 0.0, %v1079_v29 }
 0x2f5   : > { %1611 = vpow2.f32 %v1107_v30  ;;  %v1115_v38 = vmul.f32 1.442695, %v1095_v32  ;;  %v1119_v39 = vmul.f32 1.442695, %v1097_v33 }
 0x2f6   : > { %1613 = vpow2.f32 %v1111_v31  ;;  %v1029_v40 = vpop.f32.mrb[8].mxu0  ;;  %v1082_v41 = vpop.f32.mrb[12].mxu1  ;;  %v1117_v42 = vmul.f32 1.442695, %v1096_v36  ;;  %v1121_v47 = vmul.f32 1.442695, %v1098_v37 }
 0x2f7   : > { %1615 = vpow2.f32 %v1109_v34  ;;  %v1030_v43 = vadd.f32 %v1029_v40, %v648_v6  ;;  %v1083_v44 = vadd.f32 %v1082_v41, %v1994_v7  ;;  %v1031_v45 = vpop.f32.mrb[9].mxu0  ;;  %v1084_v46 = vpop.f32.mrb[13].mxu1 }
 0x2f8   : > { %1617 = vpow2.f32 %v1113_v35  ;;  %v1032_v48 = vadd.f32 %v1031_v45, %v1996_v8  ;;  %v1085_v49 = vadd.f32 %v1084_v46, %v1998_v9  ;;  %v1033_v50 = vpop.f32.mrb[10].mxu0  ;;  %v1086_v51 = vpop.f32.mrb[14].mxu1 }
 0x2f9   : > { %1619 = vpow2.f32 %v1115_v38  ;;  %v1099_v52 = vsub.f32 0.0, %v1030_v43  ;;  %v1101_v53 = vsub.f32 0.0, %v1083_v44  ;;  %v1034_v54 = vadd.f32 %v1033_v50, %v648_v6  ;;  %v1035_v55 = vpop.f32.mrb[11].mxu0  ;;  %v1088_v56 = vpop.f32.mrb[15].mxu1 }
 0x2fa   : > { %1621 = vpow2.f32 %v1119_v39  ;;  %v1100_v57 = vsub.f32 0.0, %v1032_v48  ;;  %v1102_v58 = vsub.f32 0.0, %v1085_v49  ;;  %v1087_v13 = vadd.f32 %v1086_v51, %v1994_v7 }
 0x2fb   : > { %1623 = vpow2.f32 %v1117_v42  ;;  %v1123_v59 = vmul.f32 1.442695, %v1099_v52  ;;  %v1127_v60 = vmul.f32 1.442695, %v1101_v53  ;;  %v1103_v61 = vsub.f32 0.0, %v1034_v54 }
 0x2fc   : > { %1625 = vpow2.f32 %v1121_v47  ;;  %v1125_v62 = vmul.f32 1.442695, %v1100_v57  ;;  %v1129_v63 = vmul.f32 1.442695, %v1102_v58  ;;  %v1036_v16 = vadd.f32 %v1035_v55, %v1996_v8 }
 0x2fd   : > { %1627 = vpow2.f32 %v1123_v59  ;;  %v1131_v0 = vmul.f32 1.442695, %v1103_v61  ;;  %v1089_v19 = vadd.f32 %v1088_v56, %v1998_v9  ;;  %v1105_v7 = vsub.f32 0.0, %v1087_v13 }
 0x2fe   : > { %1629 = vpow2.f32 %v1127_v60  ;;  %v1104_v26 = vsub.f32 0.0, %v1036_v16 }
 0x2ff   : > { %v1612_v1 = vpop.eup %1611  ;;  %1631 = vpow2.f32 %v1125_v62  ;;  %v1106_v28 = vsub.f32 0.0, %v1089_v19  ;;  %v1135_v32 = vmul.f32 1.442695, %v1105_v7 }
 0x300   : > { %v1614_v2 = vpop.eup %1613  ;;  %v1139_v3 = vadd.f32 1.0, %v1612_v1  ;;  %1633 = vpow2.f32 %v1129_v63  ;;  %v1133_v35 = vmul.f32 1.442695, %v1104_v26 }
 0x301   : > { %v1616_v4 = vpop.eup %1615  ;;  %v1141_v5 = vadd.f32 1.0, %v1614_v2  ;;  %1635 = vpow2.f32 %v1131_v0  ;;  %v1137_v37 = vmul.f32 1.442695, %v1106_v28 }
 0x302   : > { %v1618_v6 = vpop.eup %1617  ;;  %1637 = vrcp.f32 %v1139_v3  ;;  %v1140_v10 = vadd.f32 1.0, %v1616_v4 }
 0x303   : > { %v1620_v11 = vpop.eup %1619  ;;  %1639 = vrcp.f32 %v1141_v5  ;;  %v1142_v12 = vadd.f32 1.0, %v1618_v6 }
 0x304   : > { %v1622_v14 = vpop.eup %1621  ;;  %1641 = vrcp.f32 %v1140_v10  ;;  %v1143_v15 = vadd.f32 1.0, %v1620_v11 }
 0x305   : > { %v1624_v17 = vpop.eup %1623  ;;  %1643 = vrcp.f32 %v1142_v12  ;;  %v1145_v18 = vadd.f32 1.0, %v1622_v14 }
 0x306   : > { %v1626_v20 = vpop.eup %1625  ;;  %1645 = vrcp.f32 %v1143_v15  ;;  %v1144_v21 = vadd.f32 1.0, %v1624_v17 }
 0x307   : > { %v1628_v22 = vpop.eup %1627  ;;  %1647 = vrcp.f32 %v1145_v18  ;;  %v1146_v23 = vadd.f32 1.0, %v1626_v20 }
 0x308   : > { %v1630_v24 = vpop.eup %1629  ;;  %1649 = vrcp.f32 %v1144_v21  ;;  %v1147_v25 = vadd.f32 1.0, %v1628_v22 }
 0x309   : > { %v1632_v27 = vpop.eup %1631  ;;  %1651 = vrcp.f32 %v1146_v23  ;;  %v1149_v8 = vadd.f32 1.0, %v1630_v24 }
 0x30a   : > { %v1634_v29 = vpop.eup %1633  ;;  %1653 = vrcp.f32 %v1147_v25  ;;  %v1148_v9 = vadd.f32 1.0, %v1632_v27 }
 0x30b   : > { %v1636_v30 = vpop.eup %1635  ;;  %1655 = vrcp.f32 %v1149_v8  ;;  %v1150_v31 = vadd.f32 1.0, %v1634_v29 }
 0x30c   : > { %v1638_v33 = vpop.eup %1637  ;;  %1657 = vrcp.f32 %v1148_v9  ;;  %v1151_v34 = vadd.f32 1.0, %v1636_v30 }
 0x30d   : > { %v1640_v36 = vpop.eup %1639  ;;  %1171 = vst [vmem:[%s2015_s20] sm:$0xff] %v1638_v33  ;;  %1659 = vrcp.f32 %v1150_v31 }
 0x30e   : > { %v1642_v38 = vpop.eup %1641  ;;  %1173 = vst [vmem:[%s2015_s20 + $0x10] sm:$0xff] %v1640_v36  ;;  %1661 = vrcp.f32 %v1151_v34 }
 0x30f   : > { %v1644_v39 = vpop.eup %1643  ;;  %1172 = vst [vmem:[%s2015_s20 + $0x8] sm:$0xff] %v1642_v38  ;;  %1663 = vpow2.f32 %v1135_v32 }
 0x310   : > { %v1646_v40 = vpop.eup %1645  ;;  %1174 = vst [vmem:[%s2015_s20 + $0x18] sm:$0xff] %v1644_v39  ;;  %1665 = vpow2.f32 %v1133_v35 }
 0x311   : > { %v1648_v41 = vpop.eup %1647  ;;  %1175 = vst [vmem:[%s2015_s20 + $0x20] sm:$0xff] %v1646_v40  ;;  %1667 = vpow2.f32 %v1137_v37 }
 0x312   : > { %v1650_v42 = vpop.eup %1649  ;;  %1177 = vst [vmem:[%s2015_s20 + $0x30] sm:$0xff] %v1648_v41 }
 0x313   : > { %v1652_v43 = vpop.eup %1651  ;;  %1176 = vst [vmem:[%s2015_s20 + $0x28] sm:$0xff] %v1650_v42 }
 0x314   : > { %v1654_v44 = vpop.eup %1653  ;;  %1178 = vst [vmem:[%s2015_s20 + $0x38] sm:$0xff] %v1652_v43 }
 0x315   : > { %v1656_v45 = vpop.eup %1655  ;;  %1179 = vst [vmem:[%s2015_s20 + $0x40] sm:$0xff] %v1654_v44 }
 0x316   : > { %v1658_v46 = vpop.eup %1657  ;;  %1181 = vst [vmem:[%s2015_s20 + $0x50] sm:$0xff] %v1656_v45 }
 0x317   : > { %v1660_v47 = vpop.eup %1659  ;;  %1180 = vst [vmem:[%s2015_s20 + $0x48] sm:$0xff] %v1658_v46 }
 0x318   : > { %v1662_v48 = vpop.eup %1661  ;;  %1182 = vst [vmem:[%s2015_s20 + $0x58] sm:$0xff] %v1660_v47 }
 0x319   : > { %v1664_v49 = vpop.eup %1663  ;;  %1183 = vst [vmem:[%s2015_s20 + $0x60] sm:$0xff] %v1662_v48 }
 0x31a   : > { %v1666_v50 = vpop.eup %1665  ;;  %v1153_v51 = vadd.f32 1.0, %v1664_v49 }
 0x31b   : > { %v1668_v52 = vpop.eup %1667  ;;  %v1152_v53 = vadd.f32 1.0, %v1666_v50 }
 0x31c   : > { %1669 = vrcp.f32 %v1153_v51  ;;  %v1154_v54 = vadd.f32 1.0, %v1668_v52 }
 0x31d   : > { %1671 = vrcp.f32 %v1152_v53 }
 0x31e   : > { %1673 = vrcp.f32 %v1154_v54 }
 0x326   : > { %v1670_v55 = vpop.eup %1669 }
 0x327   : > { %v1672_v56 = vpop.eup %1671  ;;  %1185 = vst [vmem:[%s2015_s20 + $0x70] sm:$0xff] %v1670_v55 }
 0x328   : > { %v1674_v57 = vpop.eup %1673  ;;  %1184 = vst [vmem:[%s2015_s20 + $0x68] sm:$0xff] %v1672_v56 }
 0x329   : > { %1186 = vst [vmem:[%s2015_s20 + $0x78] sm:$0xff] %v1674_v57 }
 0x32a   : > { %1744 = shalt.err (!%p1741_p11)
}
 0x32b   : > { %s1745_s14 = scalar_lea.hbm %s2035_s29, 2048  ;;  %s1749_s16 = scalar_lea.hbm %s2092_s7, 4096 }
 0x32c   : > { %p1746_p13 = scmp.ne.s32.totalorder %s2035_s29, %s1745_s14  ;;  %p1750_p6 = scmp.lt.u32.totalorder %s2035_s29, %s2092_s7 }
 0x32d   : > { %p1751_p9 = scmp.lt.u32.totalorder %s1749_s16, %s1745_s14  ;;  %p1753_p12 = scmp.lt.u32.totalorder %s1745_s14, %s2035_s29 }
 0x32e   : > { %p1747_p0 = pnand %p1746_p13, %p2106_p1 }
 0x32f   : > { %p1752_p10 = por %p1751_p9, %p1750_p6 }
 0x330   : > { %p1748_p5 = pneg %p1747_p0 }
 0x331   : > { %p1754_p2 = por %p1753_p12, %p1752_p10 }
 0x333   : > { %p1755_p3 = pnand %p1754_p2, %p1748_p5 }
 0x335   : > { %1758 = shalt.err (!%p1755_p3)
}
 0x336   : > { %s1811_s13 = smov 512   ;;  %s1812_s22 = smov 32  }
 0x337   : > { %1412 = dma.vmem_to_hbm [thread:$0]  (%p2106_p1), %s2037_s21, 2048, %s2035_s29, %s2044_s8, %s1811_s13, %s1811_s13, %s1812_s22  }
 0x338 PF: > { %p1429_p4 = scmp.ge.s32.totalorder %s1801_s27, 2  ;;  %s1217_s23 = sand.u32 1, %s1789_s24  }
 0x339   : > { %p2107_p7 = scmp.ne.s32.totalorder %s2098_s12, 0  ;;  %s1218_s28 = scalar_lea.sflag [#allocation4], %s1217_s23 }
 0x33b   : > { %p1422_p8 = pnand %p1429_p4, %p2107_p7 }
 0x33d   : > { %1784 = dma.done.wait (!%p1422_p8), %s1218_s28, 2048  }
 0x33e   : > { %1786 = vsyncadd (!%p1422_p8), %s1218_s28, 4294965248  ;;  %s2108_s9 = sld [smem:[#allocation11_spill]]  ;;  %p19_p11 = scmp.ge.s32.totalorder %s1878_s30, 4  }
 0x33f   : > { %s2109_s24 = smov %s1793_s25  ;;  %s2110_s25 = smov %s1797_s26 }
 0x340   : > { %s2112_s27 = smov %s1878_s30  ;;  %21 = sbr.rel (!%p19_p11) target bundleno = 5 (0x5), region = 92 }
 0x344   : > { %s2111_s26 = smov %s2108_s9 }
 0x347   :  { %1223 = vsyncpa [#allocation3], 1 }
 0x348   :  { %1225 = vsyncpa [#allocation3 + $0x1], 1 }
 0x349   :  { %1226 = vsyncpa [#allocation6], 1 }
 0x34a   :  { %1227 = vsyncpa [#allocation4], 1 }
 0x34b   :  { %1229 = vsyncpa [#allocation4 + $0x1], 1 }

</bundles_post_ra>
